<compile_context>
chip_gen: v7x
topology: tpu7x:2x2x1
jax: 0.10.0
libtpu: 0.0.40
codegen_flags: <defaults>
</compile_context>

<pallas_src>
import functools

import jax
import jax.numpy as jnp
from jax.experimental import pallas as pl
from jax.experimental.pallas import tpu as pltpu


def _round_up(x, m):
    return ((x + m - 1) // m) * m


def _vmem_limit_bytes():
    """~75% of physical VMEM (64 MiB v7x / 128 MiB v5e,v6e), clamped 32-100 MiB."""
    try:
        cap = int(pltpu.get_tpu_info().vmem_capacity_bytes)
    except Exception:
        cap = 64 * 1024 * 1024  # conservative (v7x-sized) fallback
    return max(32 * 1024 * 1024, min((cap * 3) // 4, 100 * 1024 * 1024))


def _agg_row_tile(n_pad):
    # Keep >= 2 steps on the "parallel" dst-row axis when possible (v7x: 2 TCs).
    for c in (512, 256, 128):
        if n_pad % c == 0 and n_pad // c >= 2:
            return c
    return 128


def _agg_k_tile(n_pad, tm, itemsize, budget):
    # Largest src-reduction tile whose double-buffered A block fits `budget`.
    for c in (2048, 1024, 512, 256, 128):
        if n_pad % c == 0 and 2 * tm * c * itemsize <= budget:
            return c
    return 128


# ---------------------------------------------------------------------------
# Graph preparation (hoistable across forward calls for a static graph)
# ---------------------------------------------------------------------------
def _prepare_adjacency(adj, n_pad, tm, tk, mm_dtype):
    """Cast-then-pad A and build the per-row-tile nonzero-k-tile schedule."""
    n = adj.shape[0]
    adj_p = jnp.pad(adj.astype(mm_dtype), ((0, n_pad - n), (0, n_pad - n)))

    nrt, nkt = n_pad // tm, n_pad // tk
    nz = jnp.any(adj_p.reshape(nrt, tm, nkt, tk) != 0, axis=(1, 3))   # (nrt, nkt)
    cnt = jnp.sum(nz, axis=1).astype(jnp.int32)                       # (nrt,)
    # Nonzero tile indices first; zero-tile indices after.
    order = jnp.argsort((~nz).astype(jnp.int32), axis=1).astype(jnp.int32)
    pos = jnp.arange(nkt, dtype=jnp.int32)[None, :]
    last = jnp.maximum(cnt - 1, 0)[:, None]
    # Pad the tail with the last valid tile index -> repeated block index ->
    # Pallas skips the redundant DMA; the matmul itself is gated by `cnt`.
    kidx = jnp.take_along_axis(order, jnp.minimum(pos, last), axis=1)
    return adj_p, kidx.astype(jnp.int32), cnt


# ---------------------------------------------------------------------------
# Kernel 1: feature transform  HW = H @ W   (tiled over node rows)
# ---------------------------------------------------------------------------
def _feat_transform_kernel(h_ref, w_ref, o_ref):
    o_ref[...] = jnp.dot(
        h_ref[...], w_ref[...], preferred_element_type=jnp.float32
    ).astype(o_ref.dtype)


def _feat_transform(h, w, *, limit, out_dtype):
    n_pad, f_in = h.shape
    f_out = w.shape[1]
    isz = h.dtype.itemsize

    # Big row tile (amortize per-step overhead); keep double-buffered H / out
    # tiles plus resident W within half the VMEM budget.
    tm = 128
    for c in (2048, 1024, 512, 256, 128):
        if n_pad % c != 0:
            continue
        need = 2 * c * f_in * isz + 2 * f_in * f_out * isz + 2 * c * f_out * isz
        if need <= limit // 2:
            tm = c
            break

    cost = pl.CostEstimate(
        flops=2 * n_pad * f_in * f_out,
        transcendentals=0,
        bytes_accessed=int(h.size * isz + w.size * isz
                           + n_pad * f_out * jnp.dtype(out_dtype).itemsize),
    )
    return pl.pallas_call(
        _feat_transform_kernel,
        out_shape=jax.ShapeDtypeStruct((n_pad, f_out), out_dtype),
        grid=(n_pad // tm,),
        in_specs=[
            pl.BlockSpec((tm, f_in), lambda i: (i, 0)),
            pl.BlockSpec((f_in, f_out), lambda i: (0, 0)),  # W: fetched once
        ],
        out_specs=pl.BlockSpec((tm, f_out), lambda i: (i, 0)),
        compiler_params=pltpu.CompilerParams(
            dimension_semantics=("parallel",),
            vmem_limit_bytes=limit,
        ),
        cost_estimate=cost,
    )(h, w)


# ---------------------------------------------------------------------------
# Kernel 2: aggregation  O = act(A @ HW + b)
#   grid = (dst-row tiles ["parallel"], src-tile schedule ["arbitrary"])
#   Block-sparse over A tiles via scalar-prefetched (kidx, cnt); HW resident
#   in VMEM when it fits, otherwise streamed per k-tile.
# ---------------------------------------------------------------------------
def _aggregate_kernel(kidx_ref, cnt_ref, a_ref, hw_ref, b_ref, o_ref, acc_ref,
                      *, apply_relu, hw_resident, tk):
    i = pl.program_id(0)
    k = pl.program_id(1)

    @pl.when(k == 0)
    def _():
        acc_ref[...] = jnp.zeros_like(acc_ref)

    # Skip MXU work for all-zero A tiles (tail entries of the schedule).
    @pl.when(k < cnt_ref[i])
    def _():
        if hw_resident:
            start = pl.multiple_of(kidx_ref[i, k] * tk, tk)
            hw_blk = hw_ref[pl.ds(start, tk), :]
        else:
            hw_blk = hw_ref[...]
        acc_ref[...] += jnp.dot(
            a_ref[...], hw_blk, preferred_element_type=jnp.float32
        )

    @pl.when(k == pl.num_programs(1) - 1)
    def _():
        out = acc_ref[...] + b_ref[...]
        if apply_relu:
            out = jnp.maximum(out, 0.0)
        # NOTE: padded dst rows get bias(+ReLU) garbage; benign because padded
        # src columns of A are zero and padded rows are sliced off at the end.
        o_ref[...] = out.astype(o_ref.dtype)


def _aggregate(adj_p, hw, b, kidx, cnt, *, tm, tk, apply_relu, out_dtype, limit):
    n_pad = adj_p.shape[0]
    f_out = hw.shape[1]
    a_isz = adj_p.dtype.itemsize
    hw_isz = hw.dtype.itemsize
    out_isz = jnp.dtype(out_dtype).itemsize

    # HW residency decision against the per-generation VMEM budget (assume the
    # constant-index HW block may still get 2 buffers allocated).
    need_resident = (2 * n_pad * f_out * hw_isz      # resident HW
                     + 2 * tm * tk * a_isz           # A double buffer
                     + tm * f_out * 4                # f32 accumulator scratch
                     + 2 * tm * f_out * out_isz      # output double buffer
                     + (1 << 20))                    # bias + headroom
    hw_resident = need_resident <= int(limit * 0.9)

    if hw_resident:
        hw_spec = pl.BlockSpec((n_pad, f_out), lambda i, k, kidx, cnt: (0, 0))
    else:
        hw_spec = pl.BlockSpec((tk, f_out),
                               lambda i, k, kidx, cnt: (kidx[i, k], 0))

    kernel = functools.partial(_aggregate_kernel, apply_relu=apply_relu,
                               hw_resident=hw_resident, tk=tk)
    cost = pl.CostEstimate(
        flops=2 * n_pad * n_pad * f_out,
        transcendentals=0,
        bytes_accessed=int(adj_p.size * a_isz + hw.size * hw_isz
                           + n_pad * f_out * out_isz),
    )
    grid_spec = pltpu.PrefetchScalarGridSpec(
        num_scalar_prefetch=2,
        grid=(n_pad // tm, n_pad // tk),
        in_specs=[
            # A: data-dependent k index -> only nonzero tiles are fetched.
            pl.BlockSpec((tm, tk), lambda i, k, kidx, cnt: (i, kidx[i, k])),
            hw_spec,
            pl.BlockSpec((1, f_out), lambda i, k, kidx, cnt: (0, 0)),
        ],
        out_specs=pl.BlockSpec((tm, f_out), lambda i, k, kidx, cnt: (i, 0)),
        scratch_shapes=[pltpu.VMEM((tm, f_out), jnp.float32)],
    )
    return pl.pallas_call(
        kernel,
        grid_spec=grid_spec,
        out_shape=jax.ShapeDtypeStruct((n_pad, f_out), out_dtype),
        compiler_params=pltpu.CompilerParams(
            dimension_semantics=("parallel", "arbitrary"),
            vmem_limit_bytes=limit,
        ),
        cost_estimate=cost,
    )(kidx, cnt, adj_p, hw, b)


# ---------------------------------------------------------------------------
# Forward pass wrapper
# ---------------------------------------------------------------------------
def gcn_forward(features, adj, params, *, use_bf16=True):
    """GCN.forward: stack of GraphConv layers; ReLU on all but the last.

    nn.Dropout between layers is identity in eval mode.
    # TODO(synk): training-mode dropout (random masking) not implemented.
    """
    n, in_feats = features.shape
    n_classes = params[-1][0].shape[1]
    mm_dtype = jnp.bfloat16 if use_bf16 else jnp.float32
    mm_isz = jnp.dtype(mm_dtype).itemsize

    limit = _vmem_limit_bytes()

    # Pad node dim to a multiple of 128 (lane constraint on A's src axis).
    n_pad = _round_up(max(n, 8), 128)
    tm = _agg_row_tile(n_pad)                              # dst-row tile
    tk = _agg_k_tile(n_pad, tm, mm_isz, limit // 6)        # src reduction tile

    # Graph prep (cast BEFORE padding + block-sparsity schedule); computed
    # once per forward and shared by all layers.  Hoistable across calls.
    adj_p, kidx, cnt = _prepare_adjacency(adj, n_pad, tm, tk, mm_dtype)

    # Pad feature dims to multiples of 128 lanes; pad node rows with zeros.
    f_in_pad = _round_up(in_feats, 128)
    h = jnp.pad(features.astype(mm_dtype),
                ((0, n_pad - n), (0, f_in_pad - in_feats)))

    n_layers_total = len(params)
    for li, (w, b) in enumerate(params):
        is_last = li == n_layers_total - 1
        f_in, f_out = w.shape
        f_in_p = _round_up(f_in, 128)
        f_out_p = _round_up(f_out, 128)
        assert h.shape[1] == f_in_p

        w_p = jnp.pad(w.astype(mm_dtype),
                      ((0, f_in_p - f_in), (0, f_out_p - f_out)))
        b_p = jnp.pad(b.astype(jnp.float32), ((0, 0), (0, f_out_p - f_out)))

        # Stage 1: HW = H @ W  (once per layer, large row tiles).
        hw = _feat_transform(h, w_p, limit=limit, out_dtype=mm_dtype)

        # Stage 2: act(A @ HW + b) — block-sparse A, resident HW, f32 acc.
        out_dtype = jnp.float32 if is_last else mm_dtype
        h = _aggregate(adj_p, hw, b_p, kidx, cnt, tm=tm, tk=tk,
                       apply_relu=not is_last, out_dtype=out_dtype,
                       limit=limit)

    return h[:n, :n_classes].astype(jnp.float32)


def gcn_reference(features, adj, params, *, use_bf16=True):
    """Pure-JAX reference with the same bf16 matmul-input quantization."""
    mm_dtype = jnp.bfloat16 if use_bf16 else jnp.float32
    h = features.astype(jnp.float32)
    adj32 = adj.astype(jnp.float32)
    for i, (w, b) in enumerate(params):
        hw = jnp.dot(h.astype(mm_dtype), w.astype(mm_dtype),
                     preferred_element_type=jnp.float32)
        out = jnp.dot(adj32.astype(mm_dtype), hw.astype(mm_dtype),
                      preferred_element_type=jnp.float32) + b
        if i != len(params) - 1:
            out = jnp.maximum(out, 0.0)
        h = out
    return h


def init_params(key, in_feats, n_hidden, n_classes, n_layers):
    """Glorot-uniform-ish init matching GraphConv param shapes."""
    dims = [in_feats] + [n_hidden] * n_layers + [n_classes]
    params = []
    for li in range(len(dims) - 1):
        fin, fout = dims[li], dims[li + 1]
        key, kw = jax.random.split(key)
        limit = jnp.sqrt(6.0 / (fin + fout))
        w = jax.random.uniform(kw, (fin, fout), jnp.float32, -limit, limit)
        b = jnp.zeros((1, fout), jnp.float32)
        params.append((w, b))
    return params


if __name__ == "__main__":
    key = jax.random.PRNGKey(0)

    # Small synthetic graph: N nodes, dense weighted adjacency A[dst, src].
    N = 16
    in_feats = 8
    n_hidden = 32
    n_classes = 4
    n_layers = 2  # -> 1 input layer + 1 hidden + 1 output = 3 GraphConvs

    k_feat, k_adj, k_mask, k_param = jax.random.split(key, 4)
    features = jax.random.normal(k_feat, (N, in_feats), jnp.float32)

    edge_mask = (jax.random.uniform(k_mask, (N, N)) < 0.3).astype(jnp.float32)
    edge_w = jax.random.uniform(k_adj, (N, N), jnp.float32, 0.1, 1.0)
    adj = edge_mask * edge_w  # zero in-degree allowed (allow_zero_in_degree)

    params = init_params(k_param, in_feats, n_hidden, n_classes, n_layers)

    out = gcn_forward(features, adj, params, use_bf16=True)
    out = jax.block_until_ready(out)

    ref = jax.block_until_ready(gcn_reference(features, adj, params, use_bf16=True))

    assert out.shape == (N, n_classes)
    assert jnp.allclose(out, ref, atol=2e-2, rtol=2e-2), float(
        jnp.max(jnp.abs(out - ref))
    )

    print("KERNEL_OK")
</pallas_src>

<mosaic_0001>
module attributes {stable_mosaic.version = 11 : i64} {
  func.func @_feat_transform_kernel(%arg0: i32, %arg1: memref<128x128xbf16, #tpu.memory_space<vmem>>, %arg2: memref<128x128xbf16, #tpu.memory_space<vmem>>, %arg3: memref<128x128xbf16, #tpu.memory_space<vmem>>) attributes {dimension_semantics = [#tpu.dimension_semantics<parallel>], iteration_bounds = array<i64: 1>, scalar_prefetch = 0 : i64, scratch_operands = 0 : i64, tpu.core_type = #tpu.core_type<tc>, window_params = [{transform_indices = @transform_0, window_bounds = array<i64: 128, 128>}, {pipeline_mode = #tpu.pipeline_mode<synchronous>, transform_indices = @transform_1, window_bounds = array<i64: 128, 128>}, {transform_indices = @transform_2, window_bounds = array<i64: 128, 128>}]} {
    %c0 = arith.constant 0 : index
    %c0_0 = arith.constant 0 : index
    %0 = vector.load %arg1[%c0, %c0_0] : memref<128x128xbf16, #tpu.memory_space<vmem>>, vector<128x128xbf16>
    %c0_1 = arith.constant 0 : index
    %c0_2 = arith.constant 0 : index
    %1 = vector.load %arg2[%c0_1, %c0_2] : memref<128x128xbf16, #tpu.memory_space<vmem>>, vector<128x128xbf16>
    %cst = arith.constant dense<0.000000e+00> : vector<128x128xf32>
    %2 = tpu.matmul %0, %1, %cst {dimension_numbers = #tpu.dot_dimension_numbers<[1], [0], [0], [1], [0, 0, 1, 1], [], []>} : vector<128x128xbf16>, vector<128x128xbf16>, vector<128x128xf32> -> vector<128x128xf32>
    %3 = arith.truncf %2 : vector<128x128xf32> to vector<128x128xbf16>
    %c0_3 = arith.constant 0 : index
    %c0_4 = arith.constant 0 : index
    %4 = vector.load %arg3[%c0_3, %c0_4] : memref<128x128xbf16, #tpu.memory_space<vmem>>, vector<128x128xbf16>
    tpu.vector_store %arg3[%c0_3, %c0_4], %3 {strides = array<i32>} : memref<128x128xbf16, #tpu.memory_space<vmem>>, vector<128x128xbf16>,
    return
  }
  func.func @transform_0(%arg0: i32) -> (i32, i32) {
    %c0_i32 = arith.constant 0 : i32
    %c0_i32_0 = arith.constant 0 : i32
    return %arg0, %c0_i32 : i32, i32
  }
  func.func @transform_1(%arg0: i32) -> (i32, i32) {
    %c0_i32 = arith.constant 0 : i32
    %c0_i32_0 = arith.constant 0 : i32
    %c0_i32_1 = arith.constant 0 : i32
    return %c0_i32, %c0_i32_0 : i32, i32
  }
  func.func @transform_2(%arg0: i32) -> (i32, i32) {
    %c0_i32 = arith.constant 0 : i32
    %c0_i32_0 = arith.constant 0 : i32
    return %arg0, %c0_i32 : i32, i32
  }
}

</mosaic_0001>

<bundles_post_ra>
// kernel: tpu_custom_call.1
= control target key start
LH: loop header
LB: loop body
LE: loop exit
PB: predicated region body
PF: predicated region fallthrough
CT: control target
= control target key end

     0   :  { %7 = vsyncpa [#allocation3], 0  ;;  %s681_s0 = inlined_call_operand.hbm [shape: bf16[128,128], index: 0, kind: input, shape index: {}]   ;;  %s682_s1 = inlined_call_operand.hbm [shape: bf16[128,128], index: 1, kind: input, shape index: {}]   ;;  %s683_s2 = inlined_call_operand.hbm [shape: bf16[128,128], index: 2, kind: output, shape index: {}]  }
   0x1   :  { %8 = vsyncpa [#allocation6], 0 }
   0x2   :  { %9 = vsyncpa [#allocation4], 0  ;;  %s616_s9 = smov [#allocation2]   ;;  %s544_s13 = scalar_lea.hbm %s681_s0, 1024 }
   0x3   :  { %s15_s10 = sshll.u32 %s616_s9, 4  ;;  %p545_p0 = scmp.ne.s32.totalorder %s681_s0, %s544_s13  ;;  %s16_s10 = int_to_ptr.vmem [resolvable:$true] %s15_s10 }
   0x4   :  { %p548_p1 = scmp.lt.u32.totalorder %s544_s13, %s681_s0 }
   0x6   :  { %p550_p2 = pnand %p548_p1, %p545_p0 }
   0x8   :  { %553 = shalt.err (!%p550_p2)
}
   0x9   :  { %s554_s18 = scalar_lea.vmem %s16_s10, 1024  ;;  %p559_p4 = scmp.lt.s32.totalorder %s16_s10, %s16_s10 }
   0xa   :  { %p555_p3 = scmp.ne.s32.totalorder %s16_s10, %s554_s18  ;;  %p560_p5 = scmp.lt.s32.totalorder %s554_s18, %s554_s18 }
   0xc   :  { %p561_p6 = por %p560_p5, %p559_p4 }
   0xe   :  { %p562_p7 = pnand %p561_p6, %p555_p3 }
  0x10   :  { %565 = shalt.err (!%p562_p7)
}
  0x11   :  { %s617_s19 = smov 64   ;;  %s618_s20 = smov 4  }
  0x12   :  { %21 = dma.hbm_to_vmem [thread:$0]  %s681_s0, 1024, %s16_s10, [#allocation3], %s617_s19, %s617_s19, %s618_s20  }
  0x13   :  { %s619_s23 = smov [#allocation5]   ;;  %s566_s27 = scalar_lea.hbm %s682_s1, 1024 }
  0x14   :  { %s27_s24 = sshll.u32 %s619_s23, 4  ;;  %p567_p8 = scmp.ne.s32.totalorder %s682_s1, %s566_s27  ;;  %s28_s24 = int_to_ptr.vmem [resolvable:$true] %s27_s24 }
  0x15   :  { %p570_p9 = scmp.lt.u32.totalorder %s566_s27, %s682_s1 }
  0x17   :  { %p572_p10 = pnand %p570_p9, %p567_p8 }
  0x19   :  { %575 = shalt.err (!%p572_p10)
}
  0x1a   :  { %s576_s4 = scalar_lea.vmem %s28_s24, 1024  ;;  %p581_p12 = scmp.lt.s32.totalorder %s28_s24, %s28_s24 }
  0x1b   :  { %p577_p11 = scmp.ne.s32.totalorder %s28_s24, %s576_s4  ;;  %p582_p13 = scmp.lt.s32.totalorder %s576_s4, %s576_s4 }
  0x1d   :  { %p583_p0 = por %p582_p13, %p581_p12 }
  0x1f   :  { %p584_p1 = pnand %p583_p0, %p577_p11 }
  0x21   :  { %587 = shalt.err (!%p584_p1)
}
  0x22   :  { %33 = dma.hbm_to_vmem [thread:$0]  %s682_s1, 1024, %s28_s24, [#allocation6], %s617_s19, %s617_s19, %s618_s20  }
  0x23   :  { %610 = dma.done.wait [#allocation3], 1024  }
  0x24   :  { %611 = vsyncadd [#allocation3], 4294966272 }
  0x25   :  { %612 = dma.done.wait [#allocation6], 1024  }
  0x26   :  { %613 = vsyncadd [#allocation6], 4294966272  ;;  %v528_v0 = vld [vmem:[#allocation5] sm:$0xff]   ;;  %v529_v1 = vld [vmem:[#allocation5 + $0x8] sm:$0xff]   ;;  %s620_s1 = smov [#allocation7]  }
  0x27   :  { %475 = vmatprep.subr.bf16.mxu0 %v528_v0  ;;  %507 = vmatprep.subr.bf16.mxu1 %v528_v0  ;;  %v530_v2 = vld [vmem:[#allocation5 + $0x10] sm:$0xff]   ;;  %v531_v3 = vld [vmem:[#allocation5 + $0x18] sm:$0xff]   ;;  %v536_v4 = vld [vmem:[#allocation2] sm:$0xff]   ;;  %s351_s6 = sshll.u32 %s620_s1, 4  ;;  %s352_s6 = int_to_ptr.vmem [resolvable:$true] %s351_s6 }
  0x28   :  { %476 = vmatpush3.bf16.msra.mxu0 %v528_v0  ;;  %515 = vmatpush3.bf16.msra.mxu1 %v528_v0  ;;  %v537_v5 = vld [vmem:[#allocation2 + $0x20] sm:$0xff]   ;;  %v533_v7 = vld [vmem:[#allocation5 + $0x28] sm:$0xff]   ;;  %v534_v8 = vld [vmem:[#allocation5 + $0x30] sm:$0xff]   ;;  %s588_s7 = scalar_lea.vmem %s352_s6, 1024  ;;  %p593_p3 = scmp.lt.s32.totalorder %s352_s6, %s352_s6 }
  0x29   :  { %477 = vmatprep.subr.bf16.mxu0 %v529_v1  ;;  %508 = vmatprep.subr.bf16.mxu1 %v529_v1  ;;  %v532_v6 = vld [vmem:[#allocation5 + $0x20] sm:$0xff]   ;;  %v535_v9 = vld [vmem:[#allocation5 + $0x38] sm:$0xff]   ;;  %v538_v10 = vld [vmem:[#allocation2 + $0x8] sm:$0xff]   ;;  %p589_p2 = scmp.ne.s32.totalorder %s352_s6, %s588_s7  ;;  %p594_p4 = scmp.lt.s32.totalorder %s588_s7, %s588_s7 }
  0x2a   :  { %491 = vmatprep.mubr.bf16.mxu0 %v536_v4  ;;  %499 = vmatprep.mubr.bf16.mxu1 %v537_v5  ;;  %v539_v11 = vld [vmem:[#allocation2 + $0x28] sm:$0xff]   ;;  %v540_v12 = vld [vmem:[#allocation2 + $0x10] sm:$0xff]   ;;  %v542_v14 = vld [vmem:[#allocation2 + $0x18] sm:$0xff]  }
  0x2b   :  { %v541_v13 = vld [vmem:[#allocation2 + $0x30] sm:$0xff]   ;;  %v543_v15 = vld [vmem:[#allocation2 + $0x38] sm:$0xff]   ;;  %p595_p5 = por %p594_p4, %p593_p3 }
  0x2c   :  { %478 = vmatpush3.bf16.msra.mxu0 %v529_v1  ;;  %516 = vmatpush3.bf16.msra.mxu1 %v529_v1 }
  0x2d   :  { %479 = vmatprep.subr.bf16.mxu0 %v530_v2  ;;  %509 = vmatprep.subr.bf16.mxu1 %v530_v2  ;;  %p596_p6 = pnand %p595_p5, %p589_p2 }
  0x30   :  { %480 = vmatpush3.bf16.msra.mxu0 %v530_v2  ;;  %517 = vmatpush3.bf16.msra.mxu1 %v530_v2 }
  0x31   :  { %481 = vmatprep.subr.bf16.mxu0 %v531_v3  ;;  %510 = vmatprep.subr.bf16.mxu1 %v531_v3 }
  0x34   :  { %482 = vmatpush3.bf16.msra.mxu0 %v531_v3  ;;  %518 = vmatpush3.bf16.msra.mxu1 %v531_v3 }
  0x35   :  { %483 = vmatprep.subr.bf16.mxu0 %v532_v6  ;;  %511 = vmatprep.subr.bf16.mxu1 %v532_v6 }
  0x38   :  { %484 = vmatpush3.bf16.msra.mxu0 %v532_v6  ;;  %519 = vmatpush3.bf16.msra.mxu1 %v532_v6 }
  0x39   :  { %485 = vmatprep.subr.bf16.mxu0 %v533_v7  ;;  %512 = vmatprep.subr.bf16.mxu1 %v533_v7 }
  0x3c   :  { %486 = vmatpush3.bf16.msra.mxu0 %v533_v7  ;;  %520 = vmatpush3.bf16.msra.mxu1 %v533_v7 }
  0x3d   :  { %487 = vmatprep.subr.bf16.mxu0 %v534_v8  ;;  %513 = vmatprep.subr.bf16.mxu1 %v534_v8 }
  0x40   :  { %488 = vmatpush3.bf16.msra.mxu0 %v534_v8  ;;  %521 = vmatpush3.bf16.msra.mxu1 %v534_v8 }
  0x41   :  { %489 = vmatprep.subr.bf16.mxu0 %v535_v9  ;;  %514 = vmatprep.subr.bf16.mxu1 %v535_v9 }
  0x44   :  { %490 = vmatpush3.bf16.msra.mxu0 %v535_v9  ;;  %522 = vmatpush3.bf16.msra.mxu1 %v535_v9 }
  0x47   :  { %492 = vmatmul.mubr.bf16.vlgmr.msra.gmra.mrb[0].mxu0 %v538_v10  ;;  %500 = vmatmul.mubr.bf16.vlgmr.msra.gmra.mrb[0].mxu1 %v539_v11 }
  0x48   :  { %495 = vmatprep.mubr.bf16.mxu0 %v540_v12  ;;  %503 = vmatprep.mubr.bf16.mxu1 %v541_v13 }
  0x4f   :  { %496 = vmatmul.mubr.bf16.gmra.mrb[4].mxu0 %v542_v14  ;;  %504 = vmatmul.mubr.bf16.gmra.mrb[4].mxu1 %v543_v15 }
 0x11a   :  { %v493_v16 = vpop.f32.mrb[0].mxu0  ;;  %v501_v17 = vpop.f32.mrb[0].mxu1 }
 0x11b   :  { %v203_v18 = vpop.f32.mrb[1].mxu0  ;;  %v235_v19 = vpop.f32.mrb[1].mxu1 }
 0x11c   :  { %v494_v20 = vpop.f32.mrb[2].mxu0  ;;  %v502_v21 = vpop.f32.mrb[2].mxu1 }
 0x11d   :  { %v420_v22 = vpack.c.bf16 %v494_v20, %v493_v16  ;;  %v440_v23 = vpack.c.bf16 %v502_v21, %v501_v17  ;;  %v206_v24 = vpop.f32.mrb[3].mxu0  ;;  %v238_v25 = vpop.f32.mrb[3].mxu1 }
 0x11e   :  { %v415_v26 = vpack.c.bf16 %v206_v24, %v203_v18  ;;  %v435_v27 = vpack.c.bf16 %v238_v25, %v235_v19 }
 0x11f   :  { %452 = vst [vmem:[#allocation7 + $0x8] sm:$0xff] %v420_v22   ;;  %456 = vst [vmem:[#allocation7 + $0x28] sm:$0xff] %v440_v23  }
 0x120   :  { %416 = vst [vmem:[#allocation7] sm:$0xff] %v415_v26   ;;  %455 = vst [vmem:[#allocation7 + $0x20] sm:$0xff] %v435_v27  }
 0x122   :  { %v497_v28 = vpop.f32.mrb[4].mxu0  ;;  %v505_v29 = vpop.f32.mrb[4].mxu1 }
 0x123   :  { %v219_v30 = vpop.f32.mrb[5].mxu0  ;;  %v251_v31 = vpop.f32.mrb[5].mxu1 }
 0x124   :  { %v498_v32 = vpop.f32.mrb[6].mxu0  ;;  %v506_v33 = vpop.f32.mrb[6].mxu1 }
 0x125   :  { %v430_v34 = vpack.c.bf16 %v498_v32, %v497_v28  ;;  %v450_v35 = vpack.c.bf16 %v506_v33, %v505_v29  ;;  %v222_v36 = vpop.f32.mrb[7].mxu0  ;;  %v254_v37 = vpop.f32.mrb[7].mxu1 }
 0x126   :  { %v425_v38 = vpack.c.bf16 %v222_v36, %v219_v30  ;;  %v445_v39 = vpack.c.bf16 %v254_v37, %v251_v31 }
 0x127   :  { %454 = vst [vmem:[#allocation7 + $0x18] sm:$0xff] %v430_v34   ;;  %458 = vst [vmem:[#allocation7 + $0x38] sm:$0xff] %v450_v35  }
 0x128   :  { %453 = vst [vmem:[#allocation7 + $0x10] sm:$0xff] %v425_v38   ;;  %457 = vst [vmem:[#allocation7 + $0x30] sm:$0xff] %v445_v39  }
 0x129   :  { %599 = shalt.err (!%p596_p6)
}
 0x12a   :  { %s600_s10 = scalar_lea.hbm %s683_s2, 1024 }
 0x12b   :  { %p601_p7 = scmp.ne.s32.totalorder %s683_s2, %s600_s10  ;;  %p604_p8 = scmp.lt.u32.totalorder %s600_s10, %s683_s2 }
 0x12d   :  { %p606_p9 = pnand %p604_p8, %p601_p7 }
 0x12f   :  { %609 = shalt.err (!%p606_p9)
}
 0x130   :  { %357 = dma.vmem_to_hbm [thread:$0]  %s352_s6, 1024, %s683_s2, [#allocation4], %s617_s19, %s617_s19, %s618_s20  }
 0x131   :  { %614 = dma.done.wait [#allocation4], 1024  }
 0x132   :  { %615 = vsyncadd [#allocation4], 4294966272 }
 0x133   :  { %361 = vsyncpa [#allocation3], 1 }
 0x134   :  { %362 = vsyncpa [#allocation6], 1 }
 0x135   :  { %363 = vsyncpa [#allocation4], 1 }

</bundles_post_ra>
